<compile_context>
chip_gen: v7x
topology: tpu7x:2x2x1
jax: 0.10.0
libtpu: 0.0.40
codegen_flags: <defaults>
</compile_context>

<pallas_src>
import functools
import math

import jax
import jax.numpy as jnp
from jax.experimental import pallas as pl
from jax.experimental.pallas import tpu as pltpu

LN_EPS = 1e-5      # PyTorch nn.LayerNorm default
HIDDEN = 8         # MLP hidden width from the module
N_PACK = 6         # columns of the packed small-parameter block


def _gelu(x, approximate):
    if approximate:
        # tanh approximation -> transcendental goes to the EUP slot (VALU stays free).
        c = math.sqrt(2.0 / math.pi)
        return 0.5 * x * (1.0 + jnp.tanh(c * (x + 0.044715 * (x * x * x))))
    # PyTorch nn.GELU() default = exact erf GELU (long VPU polynomial).
    return 0.5 * x * (1.0 + jax.lax.erf(x * (1.0 / math.sqrt(2.0))))


def _mdattn_kernel(x_ref, w1_ref, pk_ref, y_ref, v_ref, *,
                   channels, bt, use_mxu, approximate):
    """Block view: x (bt, C, T); channels on sublanes, pixels on lanes."""
    w1 = w1_ref[...]                          # (8, C)   gamma already folded in
    p = pk_ref[...]                           # (8, N_PACK) packed small params
    b1 = p[:, 0:1]                            # (8, 1)   beta already folded in
    w2 = p[:, 1:2]                            # (8, 1)
    wh1 = p[:, 2:3]                           # (8, 1)
    bh1 = p[:, 3:4]                           # (8, 1)
    wh2 = p[:, 4:5]                           # (8, 1)
    b2 = p[0:1, 5:6]                          # (1, 1)
    bh2 = p[1:2, 5:6]                         # (1, 1)

    def one(x2):
        xf = x2.astype(jnp.float32)                           # (C, T)
        # --- LayerNorm stats over channels (short sublane reduce) ---------
        mean = jnp.mean(xf, axis=0, keepdims=True)            # (1, T)
        xc = xf - mean
        var = jnp.mean(xc * xc, axis=0, keepdims=True)
        xn = xc * jax.lax.rsqrt(var + LN_EPS)                 # (C, T)

        # --- Linear(C, 8): MXU when C > 8 (vex slot otherwise idle) -------
        if use_mxu:
            h = jnp.dot(w1, xn, preferred_element_type=jnp.float32) + b1
        else:
            h = b1
            for c in range(channels):                         # tiny static unroll
                h = h + w1[:, c:c + 1] * xn[c:c + 1, :]       # (8,1)*(1,T)
        h = _gelu(h, approximate)                             # (8, T)

        # --- Linear(8, 1): VPU mul + sublane (XLU) sum --------------------
        s = jnp.sum(h * w2, axis=0, keepdims=True) + b2       # (1, T)

        # --- mlp_h: Linear(1,8) -> GELU -> Linear(8,1), pointwise ---------
        hh = _gelu(wh1 * s + bh1, approximate)                # (8, T)
        v = jnp.sum(hh * wh2, axis=0, keepdims=True) + bh2    # (1, T)
        return (xf * v), v

    # Static unroll over the (small) per-block batch sub-axis; rows are
    # independent, so garbage in OOB tail rows of a partial batch block stays
    # row-confined and is masked on writeback.
    for bi in range(bt):
        y, v = one(x_ref[bi])
        y_ref[bi] = y.astype(y_ref.dtype)                     # (C, T) lane-dense store
        v_ref[bi] = v.astype(v_ref.dtype)                     # (1, T) lane-dense store


def _round128(n):
    return max(128, (n // 128) * 128)


def md_attn_tool(x, params, *, approximate_gelu=True, target_block_bytes=6 << 20):
    """x: (B, C, H, W).  Returns (y, v) matching the PyTorch MDAttnTool forward.

    approximate_gelu=False recovers bit-faithful PyTorch exact (erf) GELU; the
    default tanh approximation keeps the transcendental on the EUP (deviation
    is in the low-1e-3 range at most).
    """
    B, C, H, W = x.shape
    HW = H * W
    itemsize = jnp.dtype(x.dtype).itemsize

    (gamma, beta, w1t, b1, w2, b2, wh1, bh1, wh2, bh2) = params

    # Fold the LayerNorm affine into the first Linear (exact algebra):
    #   w1 @ (xhat*gamma + beta) + b1 = (w1 * gamma^T) @ xhat + (b1 + w1 @ beta)
    w1f = w1t.astype(jnp.float32)
    w1_eff = w1f * gamma.astype(jnp.float32)[:, 0][None, :]                   # (8, C)
    b1_eff = b1.astype(jnp.float32) + w1f @ beta.astype(jnp.float32)          # (8, 1)

    # Pack the seven tiny (8,1)/(1,1) parameters into one resident (8,6) block.
    misc = jnp.zeros((HIDDEN, 1), jnp.float32)
    misc = misc.at[0, 0].set(b2[0, 0]).at[1, 0].set(bh2[0, 0])
    packed = jnp.concatenate(
        [b1_eff, w2.astype(jnp.float32), wh1.astype(jnp.float32),
         bh1.astype(jnp.float32), wh2.astype(jnp.float32), misc], axis=1)     # (8, 6)

    # ---- generation-aware tile / VMEM budget ------------------------------
    try:
        vmem_cap = int(pltpu.get_tpu_info().vmem_capacity_bytes)
    except Exception:
        vmem_cap = 64 << 20                    # v7x per-TC VMEM; safe floor
    budget = (vmem_cap * 3) // 4               # headroom for Mosaic internal scratch

    def step_bytes(bt_, tile_):
        io = 2 * bt_ * tile_ * itemsize * (2 * C + 1)       # double-buffered x+y+v
        work = bt_ * tile_ * 4 * (2 * C + 32)               # f32 LN/MLP intermediates
        return io + work + (1 << 20)                        # + resident params

    # Spatial tile: target a few-MiB x block; keep the lane axis 128-aligned.
    if C * HW * itemsize <= target_block_bytes:
        tile = HW
    else:
        tile = min(HW, _round128(target_block_bytes // (C * itemsize)))
    while step_bytes(1, tile) > budget and tile > 128:
        tile = _round128((tile + 1) // 2)

    # Small images: amortize the ~0.35us/step pipeline overhead by covering
    # several batch rows per block (statically unrolled in the kernel).
    bt = 1
    if tile == HW:
        while (bt < min(B, 8)
               and (bt + 1) * C * HW * itemsize <= target_block_bytes
               and step_bytes(bt + 1, tile) <= budget):
            bt += 1

    # v7x megacore: guarantee at least 2 grid steps so both TCs get work.
    n_b, n_t = -(-B // bt), -(-HW // tile)
    if n_b * n_t < 2:
        if bt > 1:
            bt = (bt + 1) // 2
        elif tile >= 256:
            tile = _round128((tile + 1) // 2)
        n_b, n_t = -(-B // bt), -(-HW // tile)

    vmem_limit = int(min(max(step_bytes(bt, tile) + (8 << 20), 32 << 20), budget))

    x3 = x.reshape(B, C, HW)          # free reshape; no transposes, no padding
    kernel = functools.partial(_mdattn_kernel, channels=C, bt=bt,
                               use_mxu=(C > HIDDEN), approximate=approximate_gelu)

    cost = pl.CostEstimate(
        flops=int(B * HW * (6 * C + 80)),
        transcendentals=int(16 * B * HW),
        bytes_accessed=int((2 * B * C * HW + B * HW) * itemsize))

    y3, v3 = pl.pallas_call(
        kernel,
        out_shape=(jax.ShapeDtypeStruct((B, C, HW), x.dtype),
                   jax.ShapeDtypeStruct((B, 1, HW), x.dtype)),
        grid=(n_b, n_t),
        in_specs=[
            pl.BlockSpec((bt, C, tile), lambda b, t: (b, 0, t)),   # x
            pl.BlockSpec((HIDDEN, C), lambda b, t: (0, 0)),        # w1 (resident)
            pl.BlockSpec((HIDDEN, N_PACK), lambda b, t: (0, 0)),   # packed params
        ],
        out_specs=[
            pl.BlockSpec((bt, C, tile), lambda b, t: (b, 0, t)),   # y
            pl.BlockSpec((bt, 1, tile), lambda b, t: (b, 0, t)),   # v (lane-dense)
        ],
        compiler_params=pltpu.CompilerParams(
            dimension_semantics=("parallel", "parallel"),
            vmem_limit_bytes=vmem_limit),
        cost_estimate=cost,
    )(x3, w1_eff, packed)

    return y3.reshape(B, C, H, W), v3.reshape(B, 1, H, W)


def init_params(key, channels):
    """Deterministic synthetic parameters (PyTorch layouts).  gamma/beta are
    random (PyTorch default is ones/zeros) so the affine fold is exercised."""
    ks = jax.random.split(key, 10)

    def lin(kw, kb, fan_in, w_shape, b_shape):
        bound = 1.0 / math.sqrt(fan_in)
        w = jax.random.uniform(kw, w_shape, jnp.float32, -bound, bound)
        b = jax.random.uniform(kb, b_shape, jnp.float32, -bound, bound)
        return w, b

    gamma = 1.0 + 0.1 * jax.random.normal(ks[8], (channels, 1), jnp.float32)
    beta = 0.1 * jax.random.normal(ks[9], (channels, 1), jnp.float32)
    w1t, b1 = lin(ks[0], ks[1], channels, (HIDDEN, channels), (HIDDEN, 1))   # mlp_w[0]
    w2, b2 = lin(ks[2], ks[3], HIDDEN, (HIDDEN, 1), (1, 1))                  # mlp_w[2] (W^T)
    wh1, bh1 = lin(ks[4], ks[5], 1, (HIDDEN, 1), (HIDDEN, 1))                # mlp_h[0]
    wh2, bh2 = lin(ks[6], ks[7], HIDDEN, (HIDDEN, 1), (1, 1))                # mlp_h[2] (W^T)
    return (gamma, beta, w1t, b1, w2, b2, wh1, bh1, wh2, bh2)


def md_attn_tool_ref(x, params, *, approximate_gelu=True):
    """Pure-JAX mirror of the PyTorch forward (including its rearranges)."""
    (gamma, beta, w1t, b1, w2, b2, wh1, bh1, wh2, bh2) = params
    x_norm = jnp.transpose(x, (0, 2, 3, 1))                    # b c h w -> b h w c
    mean = jnp.mean(x_norm, axis=-1, keepdims=True)
    var = jnp.mean((x_norm - mean) ** 2, axis=-1, keepdims=True)
    x_norm = (x_norm - mean) / jnp.sqrt(var + LN_EPS) * gamma[:, 0] + beta[:, 0]
    y1 = _gelu(x_norm @ w1t.T + b1[:, 0], approximate_gelu) @ w2 + b2[0]
    y1 = jnp.transpose(y1, (0, 3, 1, 2))                       # b h w 1 -> b 1 h w
    y2 = jnp.transpose(y1, (0, 3, 2, 1))                       # b 1 h w -> b w h 1
    y2 = _gelu(y2 @ wh1.T + bh1[:, 0], approximate_gelu) @ wh2 + bh2[0]
    v = jnp.transpose(y2, (0, 3, 2, 1))                        # b w h 1 -> b 1 h w
    return x * v, v


if __name__ == "__main__":
    run = jax.jit(md_attn_tool, static_argnames=("approximate_gelu",
                                                 "target_block_bytes"))
    ok = True

    # Case 1: small C (VPU path, multi-batch blocks, megacore split).
    B, C, H, W = 2, 4, 16, 16
    kx, kp = jax.random.split(jax.random.PRNGKey(0))
    x = jax.random.normal(kx, (B, C, H, W), jnp.float32)
    params = init_params(kp, C)
    y, v = run(x, params)
    jax.block_until_ready((y, v))
    y_ref, v_ref = md_attn_tool_ref(x, params)
    ok &= (y.shape == (B, C, H, W)) and (v.shape == (B, 1, H, W))
    ok &= bool(jnp.allclose(y, y_ref, atol=1e-4, rtol=1e-4))
    ok &= bool(jnp.allclose(v, v_ref, atol=1e-4, rtol=1e-4))

    # Case 2: C > 8 (MXU path) with HW not a multiple of 128.
    B2, C2, H2, W2 = 1, 12, 10, 13
    kx2, kp2 = jax.random.split(jax.random.PRNGKey(1))
    x2 = jax.random.normal(kx2, (B2, C2, H2, W2), jnp.float32)
    params2 = init_params(kp2, C2)
    y2, v2 = run(x2, params2)
    jax.block_until_ready((y2, v2))
    y2_ref, v2_ref = md_attn_tool_ref(x2, params2)
    ok &= bool(jnp.allclose(y2, y2_ref, atol=1e-4, rtol=1e-4))
    ok &= bool(jnp.allclose(v2, v2_ref, atol=1e-4, rtol=1e-4))

    assert ok
    print("KERNEL_OK")
</pallas_src>

<mosaic_0001>
module attributes {stable_mosaic.version = 11 : i64} {
  func.func @_mdattn_kernel(%arg0: i32, %arg1: i32, %arg2: memref<1x4x256xf32, #tpu.memory_space<vmem>>, %arg3: memref<8x4xf32, #tpu.memory_space<vmem>>, %arg4: memref<8x6xf32, #tpu.memory_space<vmem>>, %arg5: memref<1x4x256xf32, #tpu.memory_space<vmem>>, %arg6: memref<1x1x256xf32, #tpu.memory_space<vmem>>) attributes {dimension_semantics = [#tpu.dimension_semantics<parallel>, #tpu.dimension_semantics<parallel>], iteration_bounds = array<i64: 2, 1>, scalar_prefetch = 0 : i64, scratch_operands = 0 : i64, tpu.core_type = #tpu.core_type<tc>, window_params = [{transform_indices = @transform_0, window_bounds = array<i64: 1, 4, 256>}, {pipeline_mode = #tpu.pipeline_mode<synchronous>, transform_indices = @transform_1, window_bounds = array<i64: 8, 4>}, {pipeline_mode = #tpu.pipeline_mode<synchronous>, transform_indices = @transform_2, window_bounds = array<i64: 8, 6>}, {transform_indices = @transform_3, window_bounds = array<i64: 1, 4, 256>}, {transform_indices = @transform_4, window_bounds = array<i64: 1, 1, 256>}]} {
    %c0 = arith.constant 0 : index
    %c0_0 = arith.constant 0 : index
    %0 = vector.load %arg3[%c0, %c0_0] : memref<8x4xf32, #tpu.memory_space<vmem>>, vector<8x4xf32>
    %c0_1 = arith.constant 0 : index
    %c0_2 = arith.constant 0 : index
    %1 = vector.load %arg4[%c0_1, %c0_2] : memref<8x6xf32, #tpu.memory_space<vmem>>, vector<8x6xf32>
    %2 = vector.extract_strided_slice %1 {offsets = [0, 0], sizes = [8, 1], strides = [1, 1]} : vector<8x6xf32> to vector<8x1xf32>
    %3 = vector.extract_strided_slice %1 {offsets = [0, 1], sizes = [8, 1], strides = [1, 1]} : vector<8x6xf32> to vector<8x1xf32>
    %4 = vector.extract_strided_slice %1 {offsets = [0, 2], sizes = [8, 1], strides = [1, 1]} : vector<8x6xf32> to vector<8x1xf32>
    %5 = vector.extract_strided_slice %1 {offsets = [0, 3], sizes = [8, 1], strides = [1, 1]} : vector<8x6xf32> to vector<8x1xf32>
    %6 = vector.extract_strided_slice %1 {offsets = [0, 4], sizes = [8, 1], strides = [1, 1]} : vector<8x6xf32> to vector<8x1xf32>
    %7 = vector.extract_strided_slice %1 {offsets = [0, 5], sizes = [1, 1], strides = [1, 1]} : vector<8x6xf32> to vector<1x1xf32>
    %8 = vector.extract_strided_slice %1 {offsets = [1, 5], sizes = [1, 1], strides = [1, 1]} : vector<8x6xf32> to vector<1x1xf32>
    %c0_3 = arith.constant 0 : index
    %c0_4 = arith.constant 0 : index
    %c0_5 = arith.constant 0 : index
    %9 = vector.load %arg2[%c0_3, %c0_4, %c0_5] : memref<1x4x256xf32, #tpu.memory_space<vmem>>, vector<1x4x256xf32>
    %10 = vector.shape_cast %9 : vector<1x4x256xf32> to vector<4x256xf32>
    %cst = arith.constant dense<0.000000e+00> : vector<256xf32>
    %11 = vector.multi_reduction <add>, %10, %cst [0] : vector<4x256xf32> to vector<256xf32>
    %12 = vector.shape_cast %11 : vector<256xf32> to vector<1x256xf32>
    %cst_6 = arith.constant 4.000000e+00 : f32
    %13 = vector.broadcast %cst_6 : f32 to vector<1x256xf32>
    %14 = arith.divf %12, %13 : vector<1x256xf32>
    %15 = vector.broadcast %14 : vector<1x256xf32> to vector<4x256xf32>
    %16 = arith.subf %10, %15 : vector<4x256xf32>
    %17 = arith.mulf %16, %16 : vector<4x256xf32>
    %cst_7 = arith.constant dense<0.000000e+00> : vector<256xf32>
    %18 = vector.multi_reduction <add>, %17, %cst_7 [0] : vector<4x256xf32> to vector<256xf32>
    %19 = vector.shape_cast %18 : vector<256xf32> to vector<1x256xf32>
    %cst_8 = arith.constant 4.000000e+00 : f32
    %20 = vector.broadcast %cst_8 : f32 to vector<1x256xf32>
    %21 = arith.divf %19, %20 : vector<1x256xf32>
    %cst_9 = arith.constant 9.99999974E-6 : f32
    %22 = vector.broadcast %cst_9 : f32 to vector<1x256xf32>
    %23 = arith.addf %21, %22 : vector<1x256xf32>
    %24 = math.rsqrt %23 : vector<1x256xf32>
    %25 = vector.broadcast %24 : vector<1x256xf32> to vector<4x256xf32>
    %26 = arith.mulf %16, %25 : vector<4x256xf32>
    %27 = vector.extract_strided_slice %0 {offsets = [0, 0], sizes = [8, 1], strides = [1, 1]} : vector<8x4xf32> to vector<8x1xf32>
    %28 = vector.extract_strided_slice %26 {offsets = [0, 0], sizes = [1, 256], strides = [1, 1]} : vector<4x256xf32> to vector<1x256xf32>
    %29 = vector.broadcast %27 : vector<8x1xf32> to vector<8x256xf32>
    %30 = vector.broadcast %28 : vector<1x256xf32> to vector<8x256xf32>
    %31 = arith.mulf %29, %30 : vector<8x256xf32>
    %32 = vector.broadcast %2 : vector<8x1xf32> to vector<8x256xf32>
    %33 = arith.addf %32, %31 : vector<8x256xf32>
    %34 = vector.extract_strided_slice %0 {offsets = [0, 1], sizes = [8, 1], strides = [1, 1]} : vector<8x4xf32> to vector<8x1xf32>
    %35 = vector.extract_strided_slice %26 {offsets = [1, 0], sizes = [1, 256], strides = [1, 1]} : vector<4x256xf32> to vector<1x256xf32>
    %36 = vector.broadcast %34 : vector<8x1xf32> to vector<8x256xf32>
    %37 = vector.broadcast %35 : vector<1x256xf32> to vector<8x256xf32>
    %38 = arith.mulf %36, %37 : vector<8x256xf32>
    %39 = arith.addf %33, %38 : vector<8x256xf32>
    %40 = vector.extract_strided_slice %0 {offsets = [0, 2], sizes = [8, 1], strides = [1, 1]} : vector<8x4xf32> to vector<8x1xf32>
    %41 = vector.extract_strided_slice %26 {offsets = [2, 0], sizes = [1, 256], strides = [1, 1]} : vector<4x256xf32> to vector<1x256xf32>
    %42 = vector.broadcast %40 : vector<8x1xf32> to vector<8x256xf32>
    %43 = vector.broadcast %41 : vector<1x256xf32> to vector<8x256xf32>
    %44 = arith.mulf %42, %43 : vector<8x256xf32>
    %45 = arith.addf %39, %44 : vector<8x256xf32>
    %46 = vector.extract_strided_slice %0 {offsets = [0, 3], sizes = [8, 1], strides = [1, 1]} : vector<8x4xf32> to vector<8x1xf32>
    %47 = vector.extract_strided_slice %26 {offsets = [3, 0], sizes = [1, 256], strides = [1, 1]} : vector<4x256xf32> to vector<1x256xf32>
    %48 = vector.broadcast %46 : vector<8x1xf32> to vector<8x256xf32>
    %49 = vector.broadcast %47 : vector<1x256xf32> to vector<8x256xf32>
    %50 = arith.mulf %48, %49 : vector<8x256xf32>
    %51 = arith.addf %45, %50 : vector<8x256xf32>
    %cst_10 = arith.constant 5.000000e-01 : f32
    %52 = vector.broadcast %cst_10 : f32 to vector<8x256xf32>
    %53 = arith.mulf %52, %51 : vector<8x256xf32>
    %54 = arith.mulf %51, %51 : vector<8x256xf32>
    %55 = arith.mulf %54, %51 : vector<8x256xf32>
    %cst_11 = arith.constant 4.471500e-02 : f32
    %56 = vector.broadcast %cst_11 : f32 to vector<8x256xf32>
    %57 = arith.mulf %56, %55 : vector<8x256xf32>
    %58 = arith.addf %51, %57 : vector<8x256xf32>
    %cst_12 = arith.constant 0.797884583 : f32
    %59 = vector.broadcast %cst_12 : f32 to vector<8x256xf32>
    %60 = arith.mulf %59, %58 : vector<8x256xf32>
    %61 = math.tanh %60 : vector<8x256xf32>
    %cst_13 = arith.constant 1.000000e+00 : f32
    %62 = vector.broadcast %cst_13 : f32 to vector<8x256xf32>
    %63 = arith.addf %62, %61 : vector<8x256xf32>
    %64 = arith.mulf %53, %63 : vector<8x256xf32>
    %65 = vector.broadcast %3 : vector<8x1xf32> to vector<8x256xf32>
    %66 = arith.mulf %64, %65 : vector<8x256xf32>
    %cst_14 = arith.constant dense<0.000000e+00> : vector<256xf32>
    %67 = vector.multi_reduction <add>, %66, %cst_14 [0] : vector<8x256xf32> to vector<256xf32>
    %68 = vector.shape_cast %67 : vector<256xf32> to vector<1x256xf32>
    %69 = vector.broadcast %7 : vector<1x1xf32> to vector<1x256xf32>
    %70 = arith.addf %68, %69 : vector<1x256xf32>
    %71 = vector.broadcast %4 : vector<8x1xf32> to vector<8x256xf32>
    %72 = vector.broadcast %70 : vector<1x256xf32> to vector<8x256xf32>
    %73 = arith.mulf %71, %72 : vector<8x256xf32>
    %74 = vector.broadcast %5 : vector<8x1xf32> to vector<8x256xf32>
    %75 = arith.addf %73, %74 : vector<8x256xf32>
    %cst_15 = arith.constant 5.000000e-01 : f32
    %76 = vector.broadcast %cst_15 : f32 to vector<8x256xf32>
    %77 = arith.mulf %76, %75 : vector<8x256xf32>
    %78 = arith.mulf %75, %75 : vector<8x256xf32>
    %79 = arith.mulf %78, %75 : vector<8x256xf32>
    %cst_16 = arith.constant 4.471500e-02 : f32
    %80 = vector.broadcast %cst_16 : f32 to vector<8x256xf32>
    %81 = arith.mulf %80, %79 : vector<8x256xf32>
    %82 = arith.addf %75, %81 : vector<8x256xf32>
    %cst_17 = arith.constant 0.797884583 : f32
    %83 = vector.broadcast %cst_17 : f32 to vector<8x256xf32>
    %84 = arith.mulf %83, %82 : vector<8x256xf32>
    %85 = math.tanh %84 : vector<8x256xf32>
    %cst_18 = arith.constant 1.000000e+00 : f32
    %86 = vector.broadcast %cst_18 : f32 to vector<8x256xf32>
    %87 = arith.addf %86, %85 : vector<8x256xf32>
    %88 = arith.mulf %77, %87 : vector<8x256xf32>
    %89 = vector.broadcast %6 : vector<8x1xf32> to vector<8x256xf32>
    %90 = arith.mulf %88, %89 : vector<8x256xf32>
    %cst_19 = arith.constant dense<0.000000e+00> : vector<256xf32>
    %91 = vector.multi_reduction <add>, %90, %cst_19 [0] : vector<8x256xf32> to vector<256xf32>
    %92 = vector.shape_cast %91 : vector<256xf32> to vector<1x256xf32>
    %93 = vector.broadcast %8 : vector<1x1xf32> to vector<1x256xf32>
    %94 = arith.addf %92, %93 : vector<1x256xf32>
    %95 = vector.broadcast %94 : vector<1x256xf32> to vector<4x256xf32>
    %96 = arith.mulf %10, %95 : vector<4x256xf32>
    %c0_20 = arith.constant 0 : index
    %c0_21 = arith.constant 0 : index
    %c0_22 = arith.constant 0 : index
    %97 = vector.load %arg5[%c0_20, %c0_21, %c0_22] : memref<1x4x256xf32, #tpu.memory_space<vmem>>, vector<1x4x256xf32>
    %98 = vector.shape_cast %97 : vector<1x4x256xf32> to vector<4x256xf32>
    %99 = vector.shape_cast %96 : vector<4x256xf32> to vector<1x4x256xf32>
    tpu.vector_store %arg5[%c0_20, %c0_21, %c0_22], %99 {strides = array<i32>} : memref<1x4x256xf32, #tpu.memory_space<vmem>>, vector<1x4x256xf32>,
    %c0_23 = arith.constant 0 : index
    %c0_24 = arith.constant 0 : index
    %c0_25 = arith.constant 0 : index
    %100 = vector.load %arg6[%c0_23, %c0_24, %c0_25] : memref<1x1x256xf32, #tpu.memory_space<vmem>>, vector<1x1x256xf32>
    %101 = vector.shape_cast %100 : vector<1x1x256xf32> to vector<1x256xf32>
    %102 = vector.shape_cast %94 : vector<1x256xf32> to vector<1x1x256xf32>
    tpu.vector_store %arg6[%c0_23, %c0_24, %c0_25], %102 {strides = array<i32>} : memref<1x1x256xf32, #tpu.memory_space<vmem>>, vector<1x1x256xf32>,
    return
  }
  func.func @transform_0(%arg0: i32, %arg1: i32) -> (i32, i32, i32) {
    %c0_i32 = arith.constant 0 : i32
    %c0_i32_0 = arith.constant 0 : i32
    return %arg0, %c0_i32, %arg1 : i32, i32, i32
  }
  func.func @transform_1(%arg0: i32, %arg1: i32) -> (i32, i32) {
    %c0_i32 = arith.constant 0 : i32
    %c0_i32_0 = arith.constant 0 : i32
    %c0_i32_1 = arith.constant 0 : i32
    return %c0_i32, %c0_i32_0 : i32, i32
  }
  func.func @transform_2(%arg0: i32, %arg1: i32) -> (i32, i32) {
    %c0_i32 = arith.constant 0 : i32
    %c0_i32_0 = arith.constant 0 : i32
    %c0_i32_1 = arith.constant 0 : i32
    return %c0_i32, %c0_i32_0 : i32, i32
  }
  func.func @transform_3(%arg0: i32, %arg1: i32) -> (i32, i32, i32) {
    %c0_i32 = arith.constant 0 : i32
    %c0_i32_0 = arith.constant 0 : i32
    return %arg0, %c0_i32, %arg1 : i32, i32, i32
  }
  func.func @transform_4(%arg0: i32, %arg1: i32) -> (i32, i32, i32) {
    %c0_i32 = arith.constant 0 : i32
    %c0_i32_0 = arith.constant 0 : i32
    return %arg0, %c0_i32, %arg1 : i32, i32, i32
  }
}

</mosaic_0001>

<bundles_post_ra>
// kernel: md_attn_tool.1
= control target key start
LH: loop header
LB: loop body
LE: loop exit
PB: predicated region body
PF: predicated region fallthrough
CT: control target
= control target key end

     0   :  { %s821_s15 = smov 0   ;;  %s823_s16 = smov 0   ;;  %s909_s0 = inlined_call_operand.vmem [shape: f32[2,4,256], index: 0, kind: input, shape index: {}]   ;;  %s910_s1 = inlined_call_operand.vmem [shape: f32[8,4], index: 1, kind: input, shape index: {}]   ;;  %s911_s2 = inlined_call_operand.vmem [shape: f32[8,6], index: 2, kind: input, shape index: {}]   ;;  %s912_s3 = inlined_call_operand.vmem [shape: f32[2,4,256], index: 3, kind: output, shape index: {0}]   ;;  %s913_s4 = inlined_call_operand.vmem [shape: f32[2,1,256], index: 4, kind: output, shape index: {1}]  }
   0x1   :  { %s825_s17 = smov 0  }
   0x2 LB: > { %s27_s18 = sadd.s32 1, %s783_s16  ;;  %p701_p0 = scmp.ge.s32.totalorder %s787_s17, 1  ;;  %s787_s17 = sphi %s825_s17, %s15_s17   ;;  %s783_s16 = sphi %s823_s16, %s915_s16   ;;  %s779_s15 = sphi %s821_s15, %s914_s15  }
   0x3   : > { %p29_p1 = scmp.ge.s32.totalorder %s27_s18, 2  ;;  %p188_p2 = scmp.lt.s32.totalorder %s787_s17, 3 }
   0x5   : > { %s917_s18 = smov (%p29_p1, %s27_s18), 0  ;;  %p189_p3 = pnand %p701_p0, %p188_p2 }
   0x6   : > { %v259_v0 = vld [vmem:[%s910_s1] sm:$0xff] (!%p189_p3)  ;;  %v789_v1 = vmov (!%p189_p3), 0   ;;  %v790_v2 = vmov (!%p189_p3), 1   ;;  %p231_p4 = scmp.lt.s32.totalorder (!%p189_p3), %s779_s15, 1  ;;  %v791_v4 = vmov (!%p189_p3), 2   ;;  %v792_v5 = vmov (!%p189_p3), 3  }
   0x7   : > { %192 = sbr.rel (%p189_p3) target bundleno = 247 (0xf7), region = 32  ;;  %742 = vset.pattern.permute.xlu0 (!%p189_p3), %v789_v1  ;;  %743 = vset.pattern.permute.xlu1 (!%p189_p3), %v790_v2  ;;  %v260_v3 = vld [vmem:[%s911_s2] sm:$0xff] (!%p189_p3)  ;;  %v793_v7 = vmov (!%p189_p3), 5   ;;  %vm265_vm0 = vcmask (!%p189_p3), 1043456   ;;  %v794_v9 = vmov (!%p189_p3), 4   ;;  %v323_v49 = vlaneseq (!%p189_p3) }
   0x8   : > { %319 = vperm.xlu0 (!%p189_p3), %742, %v259_v0   ;;  %351 = vperm.xlu1 (!%p189_p3), %743, %v259_v0  }
   0x9   : > { %v864_v51 = vshrl.u32 (!%p189_p3), %v323_v49, 7  ;;  %vm563_vm1 = vcmp.lt.s32.totalorder (!%p189_p3), %v323_v49, 256 }
   0xb   : > { %v867_v53 = vsub.s32 (!%p189_p3), 0, %v864_v51  ;;  %v329_v54 = vsub.s32 (!%p189_p3), 4, %v864_v51  ;;  %v871_v56 = vsub.s32 (!%p189_p3), 1, %v864_v51  ;;  %v360_v57 = vsub.s32 (!%p189_p3), 5, %v864_v51 }
   0xc   : > { %345 = vperm.xlu0 (!%p189_p3), %742, %v260_v3   ;;  %744 = vset.pattern.permute.xlu1 (!%p189_p3), %v791_v4  ;;  %v382_v58 = vsub.s32 (!%p189_p3), 2, %v864_v51  ;;  %v386_v59 = vsub.s32 (!%p189_p3), 6, %v864_v51 }
   0xd   : > { %377 = vperm.xlu1 (!%p189_p3), %744, %v259_v0  }
   0xe   : > { %s919_s15 = smov (!%p231_p4, %s779_s15), 1 }
   0xf   : > { %s709_s23 = sshll.u32 %s919_s15, 3  ;;  %s706_s27 = sshll.u32 %s919_s15, 1 }
  0x10   : > { %745 = vset.pattern.permute.xlu0 %v792_v5  ;;  %s238_s26 = scalar_lea.vmem %s909_s0, %s709_s23  ;;  %s248_s30 = scalar_lea.vmem %s912_s3, %s709_s23 }
  0x11   : > { %403 = vperm.xlu0 %745, %v259_v0   ;;  %746 = vset.pattern.permute.xlu1 %v790_v2  ;;  %v853_v6 = vld [vmem:[%s238_s26] sm:$0xff]  ;;  %v408_v2 = vsub.s32 3, %v864_v51  ;;  %s257_s7 = scalar_lea.vmem %s913_s4, %s706_s27 }
  0x12   : > { %447 = vperm.xlu1 %746, %v260_v3   ;;  %v263_v8 = vcombine.high %v853_v6, %v853_v6  ;;  %v266_v10 = vsel %vm265_vm0, %v853_v6, 0.0 }
  0x13   : > { %v267_v12 = vrot.slane %v266_v10, 4 }
  0x14   : > { %v273_v11 = vsel %vm265_vm0, %v263_v8, 0.0 }
  0x15   : > { %748 = vset.pattern.permute.xlu0 %v791_v4  ;;  %v274_v13 = vrot.slane %v273_v11, 4  ;;  %v268_v14 = vadd.f32 %v267_v12, %v266_v10 }
  0x16   : > { %747 = vset.pattern.permute.xlu1 %v793_v7  ;;  %471 = vperm.xlu0 %748, %v260_v3  }
  0x17   : > { %465 = vperm.xlu1 %747, %v260_v3   ;;  %v275_v15 = vadd.f32 %v274_v13, %v273_v11  ;;  %v269_v16 = vrot.slane %v268_v14, 2 }
  0x19   : > { %v276_v17 = vrot.slane %v275_v15, 2  ;;  %v270_v18 = vadd.f32 %v269_v16, %v268_v14 }
  0x1a   : > { %751 = vset.pattern.permute.xlu0 %v794_v9 }
  0x1b   : > { %749 = vset.pattern.permute.xlu1 %v792_v5  ;;  %v277_v19 = vadd.f32 %v276_v17, %v275_v15  ;;  %v271_v20 = vrot.slane %v270_v18, 1 }
  0x1c   : > { %485 = vperm.xlu1 %749, %v260_v3  }
  0x1d   : > { %v278_v21 = vrot.slane %v277_v19, 1  ;;  %v272_v22 = vadd.f32 %v271_v20, %v270_v18 }
  0x1f   : > { %v279_v23 = vadd.f32 %v278_v21, %v277_v19  ;;  %v281_v24 = vmul.f32 0.25, %v272_v22 }
  0x20   : > { %750 = vset.pattern.permute.xlu1 %v794_v9 }
  0x21   : > { %509 = vperm.xlu1 %750, %v260_v3   ;;  %v282_v25 = vmul.f32 0.25, %v279_v23  ;;  %v412_v3 = vsub.s32 7, %v864_v51 }
  0x23   : > { %v285_v26 = vcombine.low %v281_v24, %v282_v25 }
  0x25   : > { %v287_v27 = vsub.f32 %v853_v6, %v285_v26 }
  0x27   : > { %v288_v28 = vmul.f32 %v287_v27, %v287_v27 }
  0x29   : > { %v290_v29 = vcombine.high %v288_v28, %v288_v28  ;;  %v292_v30 = vsel %vm265_vm0, %v288_v28, 0.0 }
  0x2a   : > { %v293_v32 = vrot.slane %v292_v30, 4 }
  0x2b   : > { %v299_v31 = vsel %vm265_vm0, %v290_v29, 0.0 }
  0x2c   : > { %v300_v33 = vrot.slane %v299_v31, 4  ;;  %v294_v34 = vadd.f32 %v293_v32, %v292_v30 }
  0x2e   : > { %v301_v35 = vadd.f32 %v300_v33, %v299_v31  ;;  %v295_v36 = vrot.slane %v294_v34, 2 }
  0x30   : > { %v302_v37 = vrot.slane %v301_v35, 2  ;;  %v296_v38 = vadd.f32 %v295_v36, %v294_v34 }
  0x32   : > { %v303_v39 = vadd.f32 %v302_v37, %v301_v35  ;;  %v297_v40 = vrot.slane %v296_v38, 1 }
  0x34   : > { %v304_v41 = vrot.slane %v303_v39, 1  ;;  %v298_v42 = vadd.f32 %v297_v40, %v296_v38 }
  0x36   : > { %v305_v43 = vadd.f32 %v304_v41, %v303_v39  ;;  %v306_v44 = vmul.f32 0.25, %v298_v42 }
  0x38   : > { %v307_v45 = vmul.f32 0.25, %v305_v43  ;;  %v308_v46 = vadd.f32 1e-05, %v306_v44 }
  0x3a   : > { %v309_v47 = vadd.f32 1e-05, %v307_v45  ;;  %753 = vrsqrt.f32 %v308_v46 }
  0x3c   : > { %755 = vrsqrt.f32 %v309_v47 }
  0x44   : > { %v754_v48 = vpop.eup %753 }
  0x46   : > { %v756_v50 = vpop.eup %755 }
  0x47   : > { %v314_v52 = vcombine.low %v754_v48, %v756_v50 }
  0x49   : > { %v316_v55 = vmul.f32 %v314_v52, %v287_v27 }
  0x4b   : > { %v326_v60 = vrot.slane %v316_v55, %v867_v53  ;;  %v330_v61 = vrot.slane %v316_v55, %v329_v54  ;;  %v357_v62 = vrot.slane %v316_v55, %v871_v56  ;;  %v361_v63 = vrot.slane %v316_v55, %v360_v57 }
  0x4c   : > { %v383_v0 = vrot.slane %v316_v55, %v382_v58  ;;  %v387_v1 = vrot.slane %v316_v55, %v386_v59  ;;  %v409_v13 = vrot.slane %v316_v55, %v408_v2  ;;  %v413_v14 = vrot.slane %v316_v55, %v412_v3 }
  0x4d   : > { %v336_v4 = vrot.slane %v326_v60, %v867_v53  ;;  %v340_v5 = vrot.slane %v330_v61, %v867_v53  ;;  %v367_v9 = vrot.slane %v357_v62, %v871_v56  ;;  %v371_v10 = vrot.slane %v361_v63, %v871_v56 }
  0x4e   : > { %v393_v11 = vrot.slane %v383_v0, %v382_v58  ;;  %v397_v12 = vrot.slane %v387_v1, %v382_v58  ;;  %v419_v25 = vrot.slane %v409_v13, %v408_v2  ;;  %v423_v26 = vrot.slane %v413_v14, %v408_v2 }
  0x87   : > { %v320_v7 = vpop.permute.xlu0 %319  ;;  %v352_v8 = vpop.permute.xlu1 %351 }
  0x88   : > { %v341_v15 = vmul.f32 %v336_v4, %v320_v7  ;;  %v342_v16 = vmul.f32 %v340_v5, %v320_v7  ;;  %v372_v18 = vmul.f32 %v367_v9, %v352_v8  ;;  %v373_v19 = vmul.f32 %v371_v10, %v352_v8 }
  0x8b   : > { %v346_v17 = vpop.permute.xlu0 %345 }
  0x8c   : > { %v348_v20 = vadd.f32 %v346_v17, %v341_v15  ;;  %v349_v21 = vadd.f32 %v346_v17, %v342_v16  ;;  %v378_v22 = vpop.permute.xlu1 %377 }
  0x8d   : > { %v398_v23 = vmul.f32 %v393_v11, %v378_v22  ;;  %v399_v24 = vmul.f32 %v397_v12, %v378_v22 }
  0x8e   : > { %v374_v27 = vadd.f32 %v372_v18, %v348_v20  ;;  %v375_v28 = vadd.f32 %v373_v19, %v349_v21 }
  0x90   : > { %v400_v29 = vadd.f32 %v398_v23, %v374_v27  ;;  %v401_v30 = vadd.f32 %v399_v24, %v375_v28  ;;  %v404_v31 = vpop.permute.xlu0 %403 }
  0x91   : > { %v424_v32 = vmul.f32 %v419_v25, %v404_v31  ;;  %v425_v33 = vmul.f32 %v423_v26, %v404_v31  ;;  %v448_v52 = vpop.permute.xlu1 %447 }
  0x93   : > { %v426_v34 = vadd.f32 %v424_v32, %v400_v29  ;;  %v427_v35 = vadd.f32 %v425_v33, %v401_v30 }
  0x95   : > { %v430_v36 = vmul.f32 %v426_v34, %v426_v34  ;;  %v431_v37 = vmul.f32 %v427_v35, %v427_v35  ;;  %v428_v48 = vmul.f32 0.5, %v426_v34  ;;  %v429_v54 = vmul.f32 0.5, %v427_v35  ;;  %v472_v12 = vpop.permute.xlu0 %471 }
  0x96   : > { %v466_v8 = vpop.permute.xlu1 %465 }
  0x97   : > { %v432_v38 = vmul.f32 %v430_v36, %v426_v34  ;;  %v433_v39 = vmul.f32 %v431_v37, %v427_v35 }
  0x99   : > { %v434_v40 = vmul.f32 0.044715, %v432_v38  ;;  %v435_v41 = vmul.f32 0.044715, %v433_v39 }
  0x9b   : > { %v436_v42 = vadd.f32 %v434_v40, %v426_v34  ;;  %v437_v43 = vadd.f32 %v435_v41, %v427_v35  ;;  %v486_v16 = vpop.permute.xlu1 %485 }
  0x9d   : > { %v438_v44 = vmul.f32 0.7978846, %v436_v42  ;;  %v439_v45 = vmul.f32 0.7978846, %v437_v43 }
  0x9f   : > { %757 = vtanh.f32 %v438_v44 }
  0xa0   : > { %759 = vtanh.f32 %v439_v45  ;;  %v510_v34 = vpop.permute.xlu1 %509 }
  0xa9   : > { %v758_v46 = vpop.eup %757 }
  0xaa   : > { %v760_v47 = vpop.eup %759  ;;  %v442_v50 = vadd.f32 1.0, %v758_v46  ;;  %v795_v46 = vmov 1966171168  }
  0xab   : > { %v443_v55 = vadd.f32 1.0, %v760_v47  ;;  %v546_v47 = vunpack.c.l.s4 %v795_v46 }
  0xac   : > { %v444_v57 = vmul.f32 %v442_v50, %v428_v48 }
  0xad   : > { %v445_v58 = vmul.f32 %v443_v55, %v429_v54  ;;  %v547_v55 = vunpack.c.0.s8 %v546_v47 }
  0xae   : > { %v450_v59 = vmul.f32 %v448_v52, %v444_v57 }
  0xaf   : > { %v451_v60 = vmul.f32 %v448_v52, %v445_v58 }
  0xb0   : > { %v452_v61 = vrot.slane %v450_v59, 4 }
  0xb1   : > { %v458_v62 = vrot.slane %v451_v60, 4 }
  0xb2   : > { %v453_v63 = vadd.f32 %v452_v61, %v450_v59  ;;  %v550_v61 = vsub.s32 %v547_v55, %v864_v51 }
  0xb3   : > { %v459_v0 = vadd.f32 %v458_v62, %v451_v60 }
  0xb4   : > { %v454_v1 = vrot.slane %v453_v63, 2 }
  0xb5   : > { %v460_v2 = vrot.slane %v459_v0, 2 }
  0xb6   : > { %v455_v3 = vadd.f32 %v454_v1, %v453_v63 }
  0xb7   : > { %v461_v4 = vadd.f32 %v460_v2, %v459_v0 }
  0xb8   : > { %v456_v5 = vrot.slane %v455_v3, 1 }
  0xb9   : > { %v462_v7 = vrot.slane %v461_v4, 1 }
  0xba   : > { %v457_v9 = vadd.f32 %v456_v5, %v455_v3 }
  0xbb   : > { %v463_v10 = vadd.f32 %v462_v7, %v461_v4 }
  0xbc   : > { %v468_v11 = vadd.f32 %v466_v8, %v457_v9 }
  0xbd   : > { %v469_v13 = vadd.f32 %v466_v8, %v463_v10 }
  0xbe   : > { %v477_v14 = vrot.slane %v468_v11, %v867_v53 }
  0xbf   : > { %v481_v15 = vrot.slane %v469_v13, %v867_v53 }
  0xc0   : > { %v482_v17 = vmul.f32 %v477_v14, %v472_v12 }
  0xc1   : > { %v483_v18 = vmul.f32 %v481_v15, %v472_v12 }
  0xc2   : > { %v488_v19 = vadd.f32 %v486_v16, %v482_v17 }
  0xc3   : > { %v489_v20 = vadd.f32 %v486_v16, %v483_v18 }
  0xc4   : > { %v492_v21 = vmul.f32 %v488_v19, %v488_v19  ;;  %v490_v53 = vmul.f32 0.5, %v488_v19 }
  0xc5   : > { %v493_v22 = vmul.f32 %v489_v20, %v489_v20  ;;  %v491_v35 = vmul.f32 0.5, %v489_v20 }
  0xc6   : > { %v494_v23 = vmul.f32 %v492_v21, %v488_v19 }
  0xc7   : > { %v495_v24 = vmul.f32 %v493_v22, %v489_v20 }
  0xc8   : > { %v496_v25 = vmul.f32 0.044715, %v494_v23 }
  0xc9   : > { %v497_v26 = vmul.f32 0.044715, %v495_v24 }
  0xca   : > { %v498_v27 = vadd.f32 %v496_v25, %v488_v19 }
  0xcb   : > { %v499_v28 = vadd.f32 %v497_v26, %v489_v20 }
  0xcc   : > { %v500_v29 = vmul.f32 0.7978846, %v498_v27 }
  0xcd   : > { %v501_v30 = vmul.f32 0.7978846, %v499_v28 }
  0xce   : > { %761 = vtanh.f32 %v500_v29 }
  0xcf   : > { %763 = vtanh.f32 %v501_v30 }
  0xd8   : > { %v762_v31 = vpop.eup %761 }
  0xd9   : > { %v764_v32 = vpop.eup %763  ;;  %v504_v33 = vadd.f32 1.0, %v762_v31 }
  0xda   : > { %v505_v36 = vadd.f32 1.0, %v764_v32 }
  0xdb   : > { %v506_v37 = vmul.f32 %v504_v33, %v490_v53 }
  0xdc   : > { %v507_v38 = vmul.f32 %v505_v36, %v491_v35 }
  0xdd   : > { %v512_v39 = vmul.f32 %v510_v34, %v506_v37 }
  0xde   : > { %v513_v40 = vmul.f32 %v510_v34, %v507_v38 }
  0xdf   : > { %v514_v41 = vrot.slane %v512_v39, 4 }
  0xe0   : > { %v520_v42 = vrot.slane %v513_v40, 4 }
  0xe1   : > { %v515_v43 = vadd.f32 %v514_v41, %v512_v39 }
  0xe2   : > { %v521_v44 = vadd.f32 %v520_v42, %v513_v40 }
  0xe3   : > { %v516_v45 = vrot.slane %v515_v43, 2 }
  0xe4   : > { %v522_v48 = vrot.slane %v521_v44, 2 }
  0xe5   : > { %v517_v50 = vadd.f32 %v516_v45, %v515_v43 }
  0xe6   : > { %v523_v52 = vadd.f32 %v522_v48, %v521_v44 }
  0xe7   : > { %v518_v54 = vrot.slane %v517_v50, 1 }
  0xe8   : > { %v524_v57 = vrot.slane %v523_v52, 1 }
  0xe9   : > { %v519_v58 = vadd.f32 %v518_v54, %v517_v50 }
  0xea   : > { %v525_v59 = vadd.f32 %v524_v57, %v523_v52 }
  0xeb   : > { %v526_v60 = vadd.f32 %v519_v58, %v466_v8 }
  0xec   : > { %v527_v62 = vadd.f32 %v525_v59, %v466_v8 }
  0xed   : > { %v531_v63 = vrot.slane %v526_v60, %v871_v56 }
  0xee   : > { %v535_v0 = vrot.slane %v527_v62, %v871_v56  ;;  %v544_v1 = vcombine.low %v526_v60, %v527_v62 }
  0xf0   : > { %v538_v2 = vcombine.low %v531_v63, %v535_v0  ;;  %v551_v3 = vrot.slane %v544_v1, %v550_v61 }
  0xf2   : > { %v540_v4 = vmul.f32 %v538_v2, %v853_v6  ;;  %v552_v5 = vcombine.high %v551_v3, %v551_v3 }
  0xf4   : > { %541 = vst [vmem:[%s248_s30] sm:$0xff] %v540_v4  ;;  %v559_v51 = vrot.slane %v552_v5, %v550_v61 }
  0xf6   : > { %565 = vst.msk [vmem:[%s257_s7] sm:$0x3] %vm563_vm1, %v559_v51 }
  0xf7 PF: > { %s15_s17 = sadd.s32 1, %s787_s17   ;;  %s914_s15 = smov %s783_s16 }
  0xf8   : > { %p12_p5 = scmp.ge.s32.totalorder %s15_s17, 4   ;;  %s915_s16 = smov %s917_s18 }
  0xfa   :  { %14 = sbr.rel (!%p12_p5) target bundleno = 2 (0x2), region = 74 }

</bundles_post_ra>
